<compile_context>
chip_gen: v7x
topology: tpu7x:2x2x1
jax: 0.10.0
libtpu: 0.0.40
codegen_flags: <defaults>
</compile_context>

<pallas_src>
import jax
import jax.numpy as jnp
from jax.experimental import pallas as pl
from jax.experimental.pallas import tpu as pltpu

F_IN = 21     # one-hot features
F_OUT = 4     # classes
F_PAD = 32    # 21 features + 1 bias feature + zero padding


def _round_up(n, m):
    return -(-n // m) * m


def _linear_softmax_kernel(x_ref, w_ref, s_ref, o_ref):
    # x_ref: (TBP, pack*32) bf16 -- `pack` batch rows per lane-row, bias folded in.
    # w_ref: (pack*32, pack*4) bf16 -- block-diagonal copies of the padded (32, 4) W.
    # s_ref: (pack*4, pack*4) f32  -- block-diagonal 4x4 ones (per-group denominator).
    # o_ref: (TBP, pack*4) f32     -- `pack` rows of class probabilities per lane-row.
    logits = jnp.dot(x_ref[...], w_ref[...], preferred_element_type=jnp.float32)

    # Stable softmax per 4-lane group: subtracting the per-packed-row max (one
    # shared constant for all groups in the row) preserves each group's softmax
    # exactly while keeping exp() in range (|logits| <~ 5 with the default init).
    m = jnp.max(logits, axis=-1, keepdims=True)
    e = jnp.exp(logits - m)

    # Per-group sums, broadcast back to all 4 lanes of the group, via a tiny f32
    # matmul with block-diagonal ones (stays on the MXU; no lane shuffles).
    denom = jnp.dot(e, s_ref[...], preferred_element_type=jnp.float32)

    # Exact division (not pl.reciprocal(approx=True)) keeps row sums at f32
    # accuracy -- this was the source of the previous assertion failure.
    o_ref[...] = (e / denom).astype(o_ref.dtype)


def _build_packed_weights(w_t, b, pack):
    """Fold bias into a padded (32, 4) weight and replicate block-diagonally."""
    w_pad = jnp.zeros((F_PAD, F_OUT), jnp.float32)
    w_pad = w_pad.at[:F_IN, :].set(w_t.astype(jnp.float32))
    w_pad = w_pad.at[F_IN, :].set(b.astype(jnp.float32))      # bias row (constant-1 feature)
    # (pack*32, pack*4): group g uses rows 32g..32g+31 and columns 4g..4g+3.
    w_bd = jnp.kron(jnp.eye(pack, dtype=jnp.float32), w_pad).astype(jnp.bfloat16)
    # (pack*4, pack*4) block-diagonal of 4x4 ones -> per-group softmax denominators.
    s_bd = jnp.kron(jnp.eye(pack, dtype=jnp.float32),
                    jnp.ones((F_OUT, F_OUT), jnp.float32))
    return w_bd, s_bd


def linear_classifier_forward(x, w_t, b, *, tb=16384, pack=4):
    """x: (B, 21) float, w_t: (21, 4) pre-transposed weight, b: (4,) -> (B, 4) f32 probs.

    tb:   batch tile size in original rows (default 16384; ~6 MiB of
          double-buffered tiles with the packed layout, safe on v5e/v6e/v7x).
    pack: batch rows packed per MXU lane-row. 4 works everywhere (K=128);
          8 (K=256) is the better choice on v6e/v7x.
    """
    assert pack in (4, 8), "pack must be 4 (universal) or 8 (v6e/v7x)"
    B = x.shape[0]
    lanes = pack * F_PAD       # 128 or 256
    nout = pack * F_OUT        # 16 or 32

    rows = -(-B // pack)                                   # packed rows of real data
    tbp = min(max(tb // pack, 16), rows)                   # packed rows per tile
    tbp = _round_up(tbp, 16)                               # bf16 sublane-friendly
    rows_pad = _round_up(rows, tbp)                        # whole tiles only
    grid = (rows_pad // tbp,)

    # Producer-side packing (kept here so the wrapper is self-contained; ideally
    # x is emitted in this layout upstream).  0/1 one-hot features are exact in
    # bf16.  Zero-padded tail rows yield uniform probs and are sliced away.
    xp = jnp.zeros((rows_pad * pack, F_PAD), jnp.bfloat16)
    xp = xp.at[:B, :F_IN].set(x.astype(jnp.bfloat16))
    xp = xp.at[:B, F_IN].set(1.0)                          # constant-1 bias feature
    xp = xp.reshape(rows_pad, lanes)                       # free, row-major

    w_bd, s_bd = _build_packed_weights(w_t, b, pack)

    out_packed = pl.pallas_call(
        _linear_softmax_kernel,
        out_shape=jax.ShapeDtypeStruct((rows_pad, nout), jnp.float32),
        grid=grid,
        in_specs=[
            pl.BlockSpec((tbp, lanes), lambda i: (i, 0)),    # batch-tiled packed x
            pl.BlockSpec((lanes, nout), lambda i: (0, 0)),   # resident block-diag weight
            pl.BlockSpec((nout, nout), lambda i: (0, 0)),    # resident group-sum ones
        ],
        out_specs=pl.BlockSpec((tbp, nout), lambda i: (i, 0)),
        compiler_params=pltpu.CompilerParams(
            # Batch tiles are independent -> megacore sharding on v7x.
            dimension_semantics=("parallel",),
        ),
    )(xp, w_bd, s_bd)

    # (rows_pad, pack*4) row-major is exactly (rows_pad*pack, 4) row-major.
    return out_packed.reshape(rows_pad * pack, F_OUT)[:B]


def init_params(key):
    """Deterministic init matching nn.Linear(21, 4) defaults (uniform +/- 1/sqrt(fan_in))."""
    kw, kb = jax.random.split(key)
    bound = 1.0 / jnp.sqrt(jnp.float32(F_IN))
    # PyTorch stores weight as (out, in); we keep the transposed (in, out) layout.
    w = jax.random.uniform(kw, (F_OUT, F_IN), jnp.float32, -bound, bound)
    b = jax.random.uniform(kb, (F_OUT,), jnp.float32, -bound, bound)
    return w.T, b  # (21, 4), (4,)


def _reference(x, w_t, b):
    logits = x.astype(jnp.float32) @ w_t.astype(jnp.float32) + b.astype(jnp.float32)
    return jax.nn.softmax(logits, axis=-1)


if __name__ == "__main__":
    key = jax.random.PRNGKey(0)
    k_x, k_p = jax.random.split(key)

    B = 256
    # 0/1 dummy features consistent with pd.get_dummies output (exact in bf16).
    x = (jax.random.uniform(k_x, (B, F_IN)) > 0.5).astype(jnp.float32)
    w_t, b = init_params(k_p)
    ref = _reference(x, w_t, b)

    # pack=4 (universal layout) with a small tile so the multi-tile grid path runs.
    out4 = jax.block_until_ready(linear_classifier_forward(x, w_t, b, tb=128, pack=4))
    # pack=8 (256-wide K; the preferred layout on v6e/v7x).
    out8 = jax.block_until_ready(linear_classifier_forward(x, w_t, b, pack=8))

    for out in (out4, out8):
        assert out.shape == (B, F_OUT)
        assert jnp.allclose(jnp.sum(out, axis=-1), 1.0, atol=1e-3)
        assert jnp.allclose(out, ref, atol=2e-2), float(jnp.max(jnp.abs(out - ref)))

    print("KERNEL_OK")
</pallas_src>

<mosaic_0001>
module attributes {stable_mosaic.version = 11 : i64} {
  func.func @_linear_softmax_kernel(%arg0: i32, %arg1: memref<32x128xbf16, #tpu.memory_space<vmem>>, %arg2: memref<128x16xbf16, #tpu.memory_space<vmem>>, %arg3: memref<16x16xf32, #tpu.memory_space<vmem>>, %arg4: memref<32x16xf32, #tpu.memory_space<vmem>>) attributes {dimension_semantics = [#tpu.dimension_semantics<parallel>], iteration_bounds = array<i64: 2>, scalar_prefetch = 0 : i64, scratch_operands = 0 : i64, tpu.core_type = #tpu.core_type<tc>, window_params = [{transform_indices = @transform_0, window_bounds = array<i64: 32, 128>}, {pipeline_mode = #tpu.pipeline_mode<synchronous>, transform_indices = @transform_1, window_bounds = array<i64: 128, 16>}, {pipeline_mode = #tpu.pipeline_mode<synchronous>, transform_indices = @transform_2, window_bounds = array<i64: 16, 16>}, {transform_indices = @transform_3, window_bounds = array<i64: 32, 16>}]} {
    %c0 = arith.constant 0 : index
    %c0_0 = arith.constant 0 : index
    %0 = vector.load %arg1[%c0, %c0_0] : memref<32x128xbf16, #tpu.memory_space<vmem>>, vector<32x128xbf16>
    %c0_1 = arith.constant 0 : index
    %c0_2 = arith.constant 0 : index
    %1 = vector.load %arg2[%c0_1, %c0_2] : memref<128x16xbf16, #tpu.memory_space<vmem>>, vector<128x16xbf16>
    %cst = arith.constant dense<0.000000e+00> : vector<32x16xf32>
    %2 = tpu.matmul %0, %1, %cst {dimension_numbers = #tpu.dot_dimension_numbers<[1], [0], [0], [1], [0, 0, 1, 1], [], []>} : vector<32x128xbf16>, vector<128x16xbf16>, vector<32x16xf32> -> vector<32x16xf32>
    %cst_3 = arith.constant dense<0xFF800000> : vector<32xf32>
    %3 = vector.multi_reduction <maximumf>, %2, %cst_3 [1] : vector<32x16xf32> to vector<32xf32>
    %4 = vector.shape_cast %3 : vector<32xf32> to vector<32x1xf32>
    %5 = vector.broadcast %4 : vector<32x1xf32> to vector<32x16xf32>
    %6 = arith.subf %2, %5 : vector<32x16xf32>
    %7 = math.exp %6 : vector<32x16xf32>
    %c0_4 = arith.constant 0 : index
    %c0_5 = arith.constant 0 : index
    %8 = vector.load %arg3[%c0_4, %c0_5] : memref<16x16xf32, #tpu.memory_space<vmem>>, vector<16x16xf32>
    %cst_6 = arith.constant dense<0.000000e+00> : vector<32x16xf32>
    %9 = tpu.matmul %7, %8, %cst_6 {dimension_numbers = #tpu.dot_dimension_numbers<[1], [0], [0], [1], [0, 0, 1, 1], [], []>} : vector<32x16xf32>, vector<16x16xf32>, vector<32x16xf32> -> vector<32x16xf32>
    %10 = arith.divf %7, %9 : vector<32x16xf32>
    %c0_7 = arith.constant 0 : index
    %c0_8 = arith.constant 0 : index
    %11 = vector.load %arg4[%c0_7, %c0_8] : memref<32x16xf32, #tpu.memory_space<vmem>>, vector<32x16xf32>
    tpu.vector_store %arg4[%c0_7, %c0_8], %10 {strides = array<i32>} : memref<32x16xf32, #tpu.memory_space<vmem>>, vector<32x16xf32>,
    return
  }
  func.func @transform_0(%arg0: i32) -> (i32, i32) {
    %c0_i32 = arith.constant 0 : i32
    %c0_i32_0 = arith.constant 0 : i32
    return %arg0, %c0_i32 : i32, i32
  }
  func.func @transform_1(%arg0: i32) -> (i32, i32) {
    %c0_i32 = arith.constant 0 : i32
    %c0_i32_0 = arith.constant 0 : i32
    %c0_i32_1 = arith.constant 0 : i32
    return %c0_i32, %c0_i32_0 : i32, i32
  }
  func.func @transform_2(%arg0: i32) -> (i32, i32) {
    %c0_i32 = arith.constant 0 : i32
    %c0_i32_0 = arith.constant 0 : i32
    %c0_i32_1 = arith.constant 0 : i32
    return %c0_i32, %c0_i32_0 : i32, i32
  }
  func.func @transform_3(%arg0: i32) -> (i32, i32) {
    %c0_i32 = arith.constant 0 : i32
    %c0_i32_0 = arith.constant 0 : i32
    return %arg0, %c0_i32 : i32, i32
  }
}

</mosaic_0001>

<bundles_post_ra>
// kernel: tpu_custom_call.1
= control target key start
LH: loop header
LB: loop body
LE: loop exit
PB: predicated region body
PF: predicated region fallthrough
CT: control target
= control target key end

     0   :  { %s633_s12 = smov 0   ;;  %s696_s0 = inlined_call_operand.vmem [shape: bf16[64,128], index: 0, kind: input, shape index: {}]   ;;  %s697_s1 = inlined_call_operand.vmem [shape: bf16[128,16], index: 1, kind: input, shape index: {}]   ;;  %s698_s2 = inlined_call_operand.vmem [shape: f32[16,16], index: 2, kind: input, shape index: {}]   ;;  %s699_s3 = inlined_call_operand.vmem [shape: f32[64,16], index: 3, kind: output, shape index: {}]  }
   0x1 LB: > { %s496_s13 = sadd.s32 4294967295, %s611_s12   ;;  %p500_p0 = scmp.ge.s32.totalorder %s611_s12, 1  ;;  %s611_s12 = sphi %s633_s12, %s13_s12  }
   0x2   : > { %p138_p1 = scmp.lt.s32.totalorder %s611_s12, 3 }
   0x4   : > { %p139_p2 = pnand %p500_p0, %p138_p1 }
   0x5   : > { %v579_v0 = vld [vmem:[%s697_s1] sm:$0xff] (!%p139_p2)   ;;  %s501_s16 = sshll.u32 (!%p139_p2), %s496_s13, 2  ;;  %v580_v1 = vld [vmem:[%s697_s1 + $0x8] sm:$0xff] (!%p139_p2)   ;;  %v581_v2 = vld [vmem:[%s697_s1 + $0x10] sm:$0xff] (!%p139_p2)   ;;  %vm304_vm0 = vcmask (!%p139_p2), 130048  }
   0x6   : > { %142 = sbr.rel (%p139_p2) target bundleno = 644 (0x284), region = 32  ;;  %p163_p3 = scmp.lt.s32.totalorder (!%p139_p2), %s501_s16, 7  ;;  %537 = vmatprep.subr.bf16.mxu0 (!%p139_p2), %v579_v0  ;;  %v582_v3 = vld [vmem:[%s697_s1 + $0x18] sm:$0xff] (!%p139_p2)   ;;  %v583_v5 = vld [vmem:[%s697_s1 + $0x20] sm:$0xff] (!%p139_p2)   ;;  %v584_v6 = vld [vmem:[%s697_s1 + $0x28] sm:$0xff] (!%p139_p2)  }
   0x7   : > { %538 = vmatpush3.bf16.msra.mxu0 (!%p139_p2), %v579_v0  ;;  %v585_v7 = vld [vmem:[%s697_s1 + $0x30] sm:$0xff] (!%p139_p2)   ;;  %v586_v8 = vld [vmem:[%s697_s1 + $0x38] sm:$0xff] (!%p139_p2)   ;;  %v329_v18 = vld [vmem:[%s698_s2] sm:$0xff] (!%p139_p2) }
   0x8   : > { %539 = vmatprep.subr.bf16.mxu0 (!%p139_p2), %v580_v1  ;;  %v330_v19 = vld [vmem:[%s698_s2 + $0x8] sm:$0xff] (!%p139_p2) }
   0x9   : > { %v567_v20 = vpack.c.bf16 (!%p139_p2), %v330_v19, %v329_v18 }
   0xb   : > { %540 = vmatpush3.bf16.msra.mxu0 (!%p139_p2), %v580_v1  ;;  %568 = vmatprep.subr.bf16.mxu1 (!%p139_p2), %v567_v20 }
   0xc   : > { %541 = vmatprep.subr.bf16.mxu0 (!%p139_p2), %v581_v2  ;;  %570 = vmatpush3.bf16.msra.mxu1 (!%p139_p2), %v567_v20 }
   0xd   : > { %s701_s16 = smov (!%p163_p3, %s501_s16), 7 }
   0xe   : > { %s502_s21 = sshll.u32 %s701_s16, 2  ;;  %s504_s13 = sshll.u32 %s701_s16, 3 }
   0xf   : > { %s166_s24 = scalar_lea.vmem %s696_s0, %s502_s21  ;;  %542 = vmatpush3.bf16.msra.mxu0 %v581_v2  ;;  %s172_s17 = scalar_lea.vmem %s699_s3, %s504_s13 }
  0x10   : > { %v587_v4 = vld [vmem:[%s166_s24] sm:$0xff]   ;;  %543 = vmatprep.subr.bf16.mxu0 %v582_v3  ;;  %v588_v9 = vld [vmem:[%s166_s24 + $0x8] sm:$0xff]  }
  0x11   : > { %553 = vmatprep.mubr.bf16.mxu0 %v587_v4 }
  0x13   : > { %544 = vmatpush3.bf16.msra.mxu0 %v582_v3 }
  0x14   : > { %545 = vmatprep.subr.bf16.mxu0 %v583_v5 }
  0x17   : > { %546 = vmatpush3.bf16.msra.mxu0 %v583_v5 }
  0x18   : > { %547 = vmatprep.subr.bf16.mxu0 %v584_v6 }
  0x1b   : > { %548 = vmatpush3.bf16.msra.mxu0 %v584_v6 }
  0x1c   : > { %549 = vmatprep.subr.bf16.mxu0 %v585_v7 }
  0x1f   : > { %550 = vmatpush3.bf16.msra.mxu0 %v585_v7 }
  0x20   : > { %551 = vmatprep.subr.bf16.mxu0 %v586_v8 }
  0x23   : > { %552 = vmatpush3.bf16.msra.mxu0 %v586_v8 }
  0x26   : > { %554 = vmatmul.mubr.bf16.vlgmr.msra.gmra.mrb[0].mxu0 %v588_v9 }
  0xf9   : > { %v555_v10 = vpop.f32.mrb[0].mxu0 }
  0xfa   : > { %v289_v11 = vpop.f32.mrb[1].mxu0  ;;  %v311_v12 = vsel %vm304_vm0, %v555_v10, -inf }
  0xfb   : > { %312 = vmax.xlane.f32.xlu1 %v311_v12  ;;  %v556_v13 = vpop.f32.mrb[2].mxu0  ;;  %v305_v14 = vsel %vm304_vm0, %v289_v11, -inf }
  0xfc   : > { %306 = vmax.xlane.f32.xlu0 %v305_v14  ;;  %v292_v15 = vpop.f32.mrb[3].mxu0  ;;  %v314_v16 = vsel %vm304_vm0, %v556_v13, -inf }
  0xfd   : > { %v308_v17 = vsel %vm304_vm0, %v292_v15, -inf }
  0xff   : > { %315 = vmax.xlane.f32.xlu1 %v314_v16 }
 0x100   : > { %309 = vmax.xlane.f32.xlu0 %v308_v17 }
 0x188   : > { %v313_v21 = vpop.xlane.xlu1 %312 }
 0x189   : > { %v307_v22 = vpop.xlane.xlu0 %306  ;;  %v319_v24 = vsub.f32 %v555_v10, %v313_v21 }
 0x18a   : > { %v317_v23 = vsub.f32 %v289_v11, %v307_v22 }
 0x18b   : > { %v325_v30 = vmul.f32 1.442695, %v319_v24 }
 0x18c   : > { %v321_v25 = vmul.f32 1.442695, %v317_v23  ;;  %v316_v26 = vpop.xlane.xlu1 %315 }
 0x18d   : > { %v310_v27 = vpop.xlane.xlu0 %309  ;;  %v320_v28 = vsub.f32 %v556_v13, %v316_v26 }
 0x18e   : > { %589 = vpow2.f32 %v321_v25  ;;  %v318_v29 = vsub.f32 %v292_v15, %v310_v27 }
 0x18f   : > { %v327_v32 = vmul.f32 1.442695, %v320_v28 }
 0x190   : > { %v323_v31 = vmul.f32 1.442695, %v318_v29 }
 0x192   : > { %591 = vpow2.f32 %v323_v31 }
 0x193   : > { %593 = vpow2.f32 %v325_v30 }
 0x194   : > { %595 = vpow2.f32 %v327_v32 }
 0x198   : > { %v590_v33 = vpop.eup %589 }
 0x199   : > { %561 = vmatprep.mubr.msk.f32.mxu1 %vm304_vm0, %v590_v33 }
 0x19c   : > { %v592_v34 = vpop.eup %591 }
 0x19d   : > { %v594_v35 = vpop.eup %593  ;;  %562 = vmatmul.mubr.msk.f32.vlgmr.msra.gmra.mrb[0].mxu1 %vm304_vm0, %v592_v34 }
 0x19e   : > { %564 = vmatprep.mubr.msk.f32.mxu1 %vm304_vm0, %v594_v35  ;;  %v596_v36 = vpop.eup %595 }
 0x1a1   : > { %565 = vmatmul.mubr.msk.f32.gmra.mrb[2].mxu1 %vm304_vm0, %v596_v36 }
 0x270   : > { %v563_v37 = vpop.f32.mrb[0].mxu1 }
 0x271   : > { %597 = vrcp.f32 %v563_v37  ;;  %v409_v38 = vpop.f32.mrb[1].mxu1 }
 0x272   : > { %599 = vrcp.f32 %v409_v38 }
 0x274   : > { %v566_v39 = vpop.f32.mrb[2].mxu1 }
 0x275   : > { %601 = vrcp.f32 %v566_v39  ;;  %v419_v40 = vpop.f32.mrb[3].mxu1 }
 0x276   : > { %603 = vrcp.f32 %v419_v40 }
 0x27b   : > { %v598_v41 = vpop.eup %597 }
 0x27c   : > { %v600_v42 = vpop.eup %599  ;;  %v431_v44 = vmul.f32 %v598_v41, %v592_v34 }
 0x27d   : > { %v429_v43 = vmul.f32 %v600_v42, %v590_v33 }
 0x27e   : > { %437 = vst.msk [vmem:[%s172_s17 + $0x8] sm:$0xff] %vm304_vm0, %v431_v44 }
 0x27f   : > { %v602_v45 = vpop.eup %601  ;;  %436 = vst.msk [vmem:[%s172_s17] sm:$0xff] %vm304_vm0, %v429_v43 }
 0x280   : > { %v604_v46 = vpop.eup %603  ;;  %v435_v48 = vmul.f32 %v602_v45, %v596_v36 }
 0x281   : > { %v433_v47 = vmul.f32 %v604_v46, %v594_v35 }
 0x282   : > { %439 = vst.msk [vmem:[%s172_s17 + $0x18] sm:$0xff] %vm304_vm0, %v435_v48 }
 0x283   : > { %438 = vst.msk [vmem:[%s172_s17 + $0x10] sm:$0xff] %vm304_vm0, %v433_v47 }
 0x284 PF: > { %s13_s12 = sadd.s32 1, %s611_s12  }
 0x285   : > { %p10_p4 = scmp.ge.s32.totalorder %s13_s12, 4  }
 0x287   :  { %12 = sbr.rel (!%p10_p4) target bundleno = 1 (0x1), region = 62 }

</bundles_post_ra>
